<compile_context>
chip_gen: v7x
topology: tpu7x:2x2x1
jax: 0.10.0
libtpu: 0.0.40
codegen_flags: <defaults>
</compile_context>

<pallas_src>
import functools

import jax
import jax.numpy as jnp
from jax.experimental import pallas as pl
from jax.experimental.pallas import tpu as pltpu

# Double-buffered working-set budget per grid step (x block + out block).
_BLOCK_BUDGET_BYTES = 6 << 20
# Cap on the lane (last) dim of the flattened layout; >=512 lanes is already
# fully store-dense, no need for wider.
_MAX_LANES = 8192


def _round_up(a, m):
    return -(-a // m) * m


def _comb_kernel(nbasis, nw_ref, x_ref, o_ref):
    # nw_ref: SMEM f32[nbasis]              softmax-normalized weights
    # x_ref : VMEM [nbasis, tile_r, L]      input slab
    # o_ref : VMEM [tile_r, L]              output slab
    #
    # Unrolled scalar-broadcast multiply-accumulate over the tiny, static
    # basis axis; accumulate explicitly in f32 (robust for bf16 inputs).
    acc = nw_ref[0] * x_ref[0].astype(jnp.float32)
    for n in range(1, nbasis):
        acc = acc + nw_ref[n] * x_ref[n].astype(jnp.float32)
    o_ref[...] = acc.astype(o_ref.dtype)


def _pick_lanes(N, nbasis, x_itemsize, out_itemsize, sublane,
                budget_bytes=_BLOCK_BUDGET_BYTES):
    """Lane (last) dim for the flattened (R, L) layout: the largest
    multiple-of-128 divisor of N that keeps even a minimum-height block
    within the budget.  Returns None when N is not a multiple of 128
    (no lane-dense flat view exists without padding)."""
    if N % 128 != 0:
        return None
    min_row_bytes = 2 * sublane * (nbasis * x_itemsize + out_itemsize)
    cap = min(_MAX_LANES, max(128, budget_bytes // max(1, min_row_bytes)))
    m = N // 128
    for g in range(max(1, min(cap // 128, m)), 0, -1):
        if m % g == 0:
            return 128 * g
    return 128


def _pick_tile_rows(R, L, nbasis, x_itemsize, out_itemsize, sublane,
                    budget_bytes=_BLOCK_BUDGET_BYTES):
    """Rows per block: a sublane multiple whose double-buffered block cost
    fits the budget, aiming for >= ~8 grid steps (or an even count) so both
    v7x TensorCores stay balanced and each still double-buffers."""
    if R <= sublane:
        return R  # full extent along the row axis: always a legal block
    bytes_per_row = 2 * L * (nbasis * x_itemsize + out_itemsize)
    max_tr = (budget_bytes // max(1, bytes_per_row)) // sublane * sublane
    max_tr = max(sublane, min(max_tr, _round_up(R, sublane)))
    # rows/step that would give ~8 grid steps
    want = max(sublane, _round_up(-(-R // 8), sublane))
    tr = min(max_tr, want)
    # small odd grids split unevenly across v7x's two TCs; nudge down to an
    # even step count when possible
    steps = -(-R // tr)
    if 1 < steps < 8 and steps % 2 == 1:
        cand = tr - sublane
        while cand >= sublane:
            if (-(-R // cand)) % 2 == 0:
                tr = cand
                break
            cand -= sublane
    return tr


def comb_forward(w, x):
    """w: (nbasis,) f32, x: (nbasis, V, T) float -> (V, T) in x.dtype."""
    nbasis, V, T = x.shape
    assert w.shape == (nbasis,)

    # Softmax over the tiny (nbasis,) weight vector is parameter glue;
    # the O(N*V*T) weighted reduction (the hot path) runs in the kernel.
    norm_w = jax.nn.softmax(w.astype(jnp.float32))

    x_itemsize = jnp.dtype(x.dtype).itemsize
    out_dtype = x.dtype
    out_itemsize = jnp.dtype(out_dtype).itemsize
    sublane = {4: 8, 2: 16, 1: 32}.get(x_itemsize, 8)

    N = V * T
    L = _pick_lanes(N, nbasis, x_itemsize, out_itemsize, sublane)
    if L is not None:
        # Lane-dense flat view: x[n] is contiguous over (V, T), so this
        # reshape (and the output reshape back) is free layout plumbing.
        R = N // L
        x2d = x.reshape(nbasis, R, L)
    else:
        # V*T not a multiple of 128: keep (V, T).  The last block dim spans
        # the full T extent (always legal); only the ragged row tail uses
        # masked stores.
        R, L = V, T
        x2d = x

    tile_r = _pick_tile_rows(R, L, nbasis, x_itemsize, out_itemsize, sublane)
    grid_r = pl.cdiv(R, tile_r)

    # Only raise the scoped-VMEM limit when the (double-buffered) working
    # set actually needs it (rare ragged-T fallback); otherwise keep the
    # generation defaults (16 MiB v5e / 32 MiB v6e,v7x).
    block_bytes = tile_r * L * (nbasis * x_itemsize + out_itemsize)
    need = 2 * block_bytes + (2 << 20)
    vmem_limit = None if need <= (16 << 20) else need

    kernel = functools.partial(_comb_kernel, nbasis)

    cost = pl.CostEstimate(
        flops=2 * nbasis * N,
        transcendentals=0,
        bytes_accessed=nbasis * N * x_itemsize + N * out_itemsize + 4 * nbasis,
    )

    out2d = pl.pallas_call(
        kernel,
        out_shape=jax.ShapeDtypeStruct((R, L), out_dtype),
        grid=(grid_r,),
        in_specs=[
            # full (nbasis,) weight vector, resident in SMEM for every block
            pl.BlockSpec(memory_space=pltpu.MemorySpace.SMEM),
            # one (nbasis, tile_r, L) slab of x per grid step
            pl.BlockSpec((nbasis, tile_r, L), lambda i: (0, i, 0)),
        ],
        out_specs=pl.BlockSpec((tile_r, L), lambda i: (i, 0)),
        compiler_params=pltpu.CompilerParams(
            dimension_semantics=("parallel",),
            vmem_limit_bytes=vmem_limit,
        ),
        cost_estimate=cost,
    )(norm_w, x2d)

    return out2d.reshape(V, T) if (R, L) != (V, T) else out2d


if __name__ == "__main__":
    key = jax.random.PRNGKey(0)

    # Primary test: shapes consistent with the module (nbasis basis maps of
    # a (V, T) field).  Module __init__ uses zeros for w; use deterministic
    # non-zero values so the softmax path is actually exercised.
    nbasis, V, T = 4, 16, 256
    kw, kx, kw2, kx2 = jax.random.split(key, 4)
    w = 0.5 * jax.random.normal(kw, (nbasis,), dtype=jnp.float32)
    x = jax.random.normal(kx, (nbasis, V, T), dtype=jnp.float32)

    out = jax.block_until_ready(comb_forward(w, x))
    ref = jnp.einsum("n,nvt->vt", jax.nn.softmax(w), x)
    assert out.shape == (V, T)
    assert jnp.allclose(out, ref, atol=1e-5, rtol=1e-5)

    # Ragged test: V*T not a multiple of 128 -> full-T blocks, cdiv grid
    # with a masked tail block (exercises the new ragged path).
    nb2, V2, T2 = 3, 13, 40
    w2 = 0.5 * jax.random.normal(kw2, (nb2,), dtype=jnp.float32)
    x2 = jax.random.normal(kx2, (nb2, V2, T2), dtype=jnp.float32)
    out2 = jax.block_until_ready(comb_forward(w2, x2))
    ref2 = jnp.einsum("n,nvt->vt", jax.nn.softmax(w2), x2)
    assert out2.shape == (V2, T2)
    assert jnp.allclose(out2, ref2, atol=1e-5, rtol=1e-5)

    print("KERNEL_OK")
</pallas_src>

<mosaic_0001>
module attributes {stable_mosaic.version = 11 : i64} {
  func.func @_comb_kernel(%arg0: i32, %arg1: memref<4xf32, #tpu.memory_space<smem>>, %arg2: memref<4x1x4096xf32, #tpu.memory_space<vmem>>, %arg3: memref<1x4096xf32, #tpu.memory_space<vmem>>) attributes {dimension_semantics = [#tpu.dimension_semantics<parallel>], iteration_bounds = array<i64: 1>, scalar_prefetch = 0 : i64, scratch_operands = 0 : i64, tpu.core_type = #tpu.core_type<tc>, window_params = [{transform_indices = @transform_0, window_bounds = array<i64: 4>}, {transform_indices = @transform_1, window_bounds = array<i64: 4, 1, 4096>}, {transform_indices = @transform_2, window_bounds = array<i64: 1, 4096>}]} {
    %c0 = arith.constant 0 : index
    %0 = memref.load %arg1[%c0] : memref<4xf32, #tpu.memory_space<smem>>
    %c0_0 = arith.constant 0 : index
    %c0_1 = arith.constant 0 : index
    %c0_2 = arith.constant 0 : index
    %1 = vector.load %arg2[%c0_0, %c0_1, %c0_2] : memref<4x1x4096xf32, #tpu.memory_space<vmem>>, vector<1x1x4096xf32>
    %2 = vector.shape_cast %1 : vector<1x1x4096xf32> to vector<1x4096xf32>
    %3 = vector.broadcast %0 : f32 to vector<1x4096xf32>
    %4 = arith.mulf %3, %2 : vector<1x4096xf32>
    %c1 = arith.constant 1 : index
    %5 = memref.load %arg1[%c1] : memref<4xf32, #tpu.memory_space<smem>>
    %c1_3 = arith.constant 1 : index
    %c0_4 = arith.constant 0 : index
    %c0_5 = arith.constant 0 : index
    %6 = vector.load %arg2[%c1_3, %c0_4, %c0_5] : memref<4x1x4096xf32, #tpu.memory_space<vmem>>, vector<1x1x4096xf32>
    %7 = vector.shape_cast %6 : vector<1x1x4096xf32> to vector<1x4096xf32>
    %8 = vector.broadcast %5 : f32 to vector<1x4096xf32>
    %9 = arith.mulf %8, %7 : vector<1x4096xf32>
    %10 = arith.addf %4, %9 : vector<1x4096xf32>
    %c2 = arith.constant 2 : index
    %11 = memref.load %arg1[%c2] : memref<4xf32, #tpu.memory_space<smem>>
    %c2_6 = arith.constant 2 : index
    %c0_7 = arith.constant 0 : index
    %c0_8 = arith.constant 0 : index
    %12 = vector.load %arg2[%c2_6, %c0_7, %c0_8] : memref<4x1x4096xf32, #tpu.memory_space<vmem>>, vector<1x1x4096xf32>
    %13 = vector.shape_cast %12 : vector<1x1x4096xf32> to vector<1x4096xf32>
    %14 = vector.broadcast %11 : f32 to vector<1x4096xf32>
    %15 = arith.mulf %14, %13 : vector<1x4096xf32>
    %16 = arith.addf %10, %15 : vector<1x4096xf32>
    %c3 = arith.constant 3 : index
    %17 = memref.load %arg1[%c3] : memref<4xf32, #tpu.memory_space<smem>>
    %c3_9 = arith.constant 3 : index
    %c0_10 = arith.constant 0 : index
    %c0_11 = arith.constant 0 : index
    %18 = vector.load %arg2[%c3_9, %c0_10, %c0_11] : memref<4x1x4096xf32, #tpu.memory_space<vmem>>, vector<1x1x4096xf32>
    %19 = vector.shape_cast %18 : vector<1x1x4096xf32> to vector<1x4096xf32>
    %20 = vector.broadcast %17 : f32 to vector<1x4096xf32>
    %21 = arith.mulf %20, %19 : vector<1x4096xf32>
    %22 = arith.addf %16, %21 : vector<1x4096xf32>
    %c0_12 = arith.constant 0 : index
    %c0_13 = arith.constant 0 : index
    %23 = vector.load %arg3[%c0_12, %c0_13] : memref<1x4096xf32, #tpu.memory_space<vmem>>, vector<1x4096xf32>
    tpu.vector_store %arg3[%c0_12, %c0_13], %22 {strides = array<i32>} : memref<1x4096xf32, #tpu.memory_space<vmem>>, vector<1x4096xf32>,
    return
  }
  func.func @transform_0(%arg0: i32) -> i32 {
    %c0_i32 = arith.constant 0 : i32
    %c0_i32_0 = arith.constant 0 : i32
    return %c0_i32 : i32
  }
  func.func @transform_1(%arg0: i32) -> (i32, i32, i32) {
    %c0_i32 = arith.constant 0 : i32
    %c0_i32_0 = arith.constant 0 : i32
    %c0_i32_1 = arith.constant 0 : i32
    return %c0_i32, %arg0, %c0_i32_0 : i32, i32, i32
  }
  func.func @transform_2(%arg0: i32) -> (i32, i32) {
    %c0_i32 = arith.constant 0 : i32
    %c0_i32_0 = arith.constant 0 : i32
    return %arg0, %c0_i32 : i32, i32
  }
}

</mosaic_0001>

<bundles_post_ra>
// kernel: tpu_custom_call.1
= control target key start
LH: loop header
LB: loop body
LE: loop exit
PB: predicated region body
PF: predicated region fallthrough
CT: control target
= control target key end

     0   :  { %7 = vsyncpa [#allocation5], 0  ;;  %s236_s0 = inlined_call_operand.hbm [shape: f32[4], index: 0, kind: input, shape index: {}]   ;;  %s237_s1 = inlined_call_operand.hbm [shape: f32[4,1,4096], index: 1, kind: input, shape index: {}]   ;;  %s238_s2 = inlined_call_operand.hbm [shape: f32[1,4096], index: 2, kind: output, shape index: {}]  }
   0x1   :  { %8 = vsyncpa [#allocation3], 0 }
   0x2   :  { %9 = vsyncpa [#allocation4], 0  ;;  %s120_s11 = scalar_lea.hbm %s236_s0, 16 }
   0x3   :  { %p121_p0 = scmp.ne.s32.totalorder %s236_s0, %s120_s11  ;;  %p124_p1 = scmp.lt.u32.totalorder %s120_s11, %s236_s0 }
   0x5   :  { %p126_p2 = pnand %p124_p1, %p121_p0 }
   0x7   :  { %129 = shalt.err (!%p126_p2)
}
   0x8   :  { %s180_s16 = smov [#allocation2]   ;;  %s181_s19 = smov [#allocation6]  }
   0x9   :  { %17 = dma.hbm_to_smem %s236_s0, 16, %s180_s16, [#allocation5]  }
   0xa   :  { %s23_s20 = sshll.u32 %s181_s19, 4  ;;  %s130_s23 = scalar_lea.hbm %s237_s1, 2048  ;;  %s24_s20 = int_to_ptr.vmem [resolvable:$true] %s23_s20 }
   0xb   :  { %p131_p3 = scmp.ne.s32.totalorder %s237_s1, %s130_s23  ;;  %p134_p4 = scmp.lt.u32.totalorder %s130_s23, %s237_s1 }
   0xd   :  { %p136_p5 = pnand %p134_p4, %p131_p3 }
   0xf   :  { %139 = shalt.err (!%p136_p5)
}
  0x10   :  { %s140_s28 = scalar_lea.vmem %s24_s20, 2048  ;;  %p145_p7 = scmp.lt.s32.totalorder %s24_s20, %s24_s20 }
  0x11   :  { %p141_p6 = scmp.ne.s32.totalorder %s24_s20, %s140_s28  ;;  %p146_p8 = scmp.lt.s32.totalorder %s140_s28, %s140_s28 }
  0x13   :  { %p147_p9 = por %p146_p8, %p145_p7 }
  0x15   :  { %p148_p10 = pnand %p147_p9, %p141_p6 }
  0x17   :  { %151 = shalt.err (!%p148_p10)
}
  0x18   :  { %s182_s0 = smov 512   ;;  %s183_s29 = smov 32  }
  0x19   :  { %29 = dma.hbm_to_vmem [thread:$0]  %s237_s1, 2048, %s24_s20, [#allocation3], %s182_s0, %s182_s0, %s183_s29  }
  0x1a   :  { %174 = dma.done.wait [#allocation5], 16  }
  0x1b   :  { %175 = vsyncadd [#allocation5], 4294967280 }
  0x1c   :  { %176 = dma.done.wait [#allocation3], 2048  }
  0x1d   :  { %177 = vsyncadd [#allocation3], 4294965248 }
  0x1e   :  { %36 = sfence }
  0x1f   :  { %s37_s4 = sld [smem:[#allocation2]]  ;;  %s112_s5 = sld [smem:[#allocation2 + $0x1]]  ;;  %v38_v0 = vld [vmem:[#allocation6] sm:$0xff]  ;;  %v39_v3 = vld [vmem:[#allocation6 + $0x8] sm:$0xff]  ;;  %v40_v9 = vld [vmem:[#allocation6 + $0x10] sm:$0xff] }
  0x20   :  { %s113_s6 = sld [smem:[#allocation2 + $0x2]]  ;;  %s114_s7 = sld [smem:[#allocation2 + $0x3]]  ;;  %v49_v1 = vld [vmem:[#allocation6 + $0x20] sm:$0xff]  ;;  %v50_v4 = vld [vmem:[#allocation6 + $0x28] sm:$0xff]  ;;  %v51_v15 = vld [vmem:[#allocation6 + $0x30] sm:$0xff] }
  0x21   :  { %v64_v2 = vld [vmem:[#allocation6 + $0x40] sm:$0xff]  ;;  %v65_v8 = vld [vmem:[#allocation6 + $0x48] sm:$0xff]  ;;  %v66_v16 = vld [vmem:[#allocation6 + $0x50] sm:$0xff]  ;;  %s184_s1 = smov [#allocation7]  }
  0x22   :  { %v79_v7 = vld [vmem:[#allocation6 + $0x60] sm:$0xff]  ;;  %v80_v14 = vld [vmem:[#allocation6 + $0x68] sm:$0xff]  ;;  %v41_v20 = vld [vmem:[#allocation6 + $0x18] sm:$0xff]  ;;  %s102_s8 = sshll.u32 %s184_s1, 4  ;;  %s103_s8 = int_to_ptr.vmem [resolvable:$true] %s102_s8 }
  0x23   :  { %v52_v21 = vld [vmem:[#allocation6 + $0x38] sm:$0xff]  ;;  %v81_v27 = vld [vmem:[#allocation6 + $0x70] sm:$0xff]  ;;  %s152_s9 = scalar_lea.vmem %s103_s8, 512  ;;  %p157_p12 = scmp.lt.s32.totalorder %s103_s8, %s103_s8 }
  0x24   :  { %v67_v22 = vld [vmem:[#allocation6 + $0x58] sm:$0xff]  ;;  %p153_p11 = scmp.ne.s32.totalorder %s103_s8, %s152_s9  ;;  %p158_p13 = scmp.lt.s32.totalorder %s152_s9, %s152_s9 }
  0x25   :  { %v42_v5 = vstv %s37_s4  ;;  %v53_v6 = vstv %s112_s5  ;;  %v82_v32 = vld [vmem:[#allocation6 + $0x78] sm:$0xff] }
  0x26   :  { %v43_v10 = vmul.f32 %v42_v5, %v38_v0  ;;  %v54_v11 = vmul.f32 %v53_v6, %v49_v1  ;;  %v68_v12 = vstv %s113_s6  ;;  %v83_v13 = vstv %s114_s7  ;;  %p159_p0 = por %p158_p13, %p157_p12 }
  0x27   :  { %v69_v17 = vmul.f32 %v68_v12, %v64_v2  ;;  %v44_v18 = vmul.f32 %v42_v5, %v39_v3  ;;  %v55_v19 = vmul.f32 %v53_v6, %v50_v4  ;;  %v84_v24 = vmul.f32 %v83_v13, %v79_v7 }
  0x28   :  { %v58_v23 = vadd.f32 %v54_v11, %v43_v10  ;;  %v70_v25 = vmul.f32 %v68_v12, %v65_v8  ;;  %v45_v26 = vmul.f32 %v42_v5, %v40_v9  ;;  %v85_v29 = vmul.f32 %v83_v13, %v80_v14  ;;  %p160_p1 = pnand %p159_p0, %p153_p11 }
  0x29   :  { %v59_v28 = vadd.f32 %v55_v19, %v44_v18  ;;  %v56_v30 = vmul.f32 %v53_v6, %v51_v15  ;;  %v71_v31 = vmul.f32 %v68_v12, %v66_v16  ;;  %v46_v34 = vmul.f32 %v42_v5, %v41_v20 }
  0x2a   :  { %v73_v33 = vadd.f32 %v69_v17, %v58_v23  ;;  %v57_v35 = vmul.f32 %v53_v6, %v52_v21  ;;  %v72_v36 = vmul.f32 %v68_v12, %v67_v22  ;;  %v86_v39 = vmul.f32 %v83_v13, %v81_v27 }
  0x2b   :  { %v74_v37 = vadd.f32 %v70_v25, %v59_v28  ;;  %v60_v38 = vadd.f32 %v56_v30, %v45_v26  ;;  %v87_v42 = vmul.f32 %v83_v13, %v82_v32 }
  0x2c   :  { %v88_v40 = vadd.f32 %v84_v24, %v73_v33  ;;  %v61_v41 = vadd.f32 %v57_v35, %v46_v34 }
  0x2d   :  { %v89_v43 = vadd.f32 %v85_v29, %v74_v37  ;;  %v75_v44 = vadd.f32 %v71_v31, %v60_v38 }
  0x2e   :  { %92 = vst [vmem:[#allocation7] sm:$0xff] %v88_v40  ;;  %v76_v45 = vadd.f32 %v72_v36, %v61_v41 }
  0x2f   :  { %93 = vst [vmem:[#allocation7 + $0x8] sm:$0xff] %v89_v43  ;;  %v90_v46 = vadd.f32 %v86_v39, %v75_v44 }
  0x30   :  { %v91_v47 = vadd.f32 %v87_v42, %v76_v45 }
  0x31   :  { %94 = vst [vmem:[#allocation7 + $0x10] sm:$0xff] %v90_v46 }
  0x32   :  { %95 = vst [vmem:[#allocation7 + $0x18] sm:$0xff] %v91_v47 }
  0x33   :  { %163 = shalt.err (!%p160_p1)
}
  0x34   :  { %s164_s12 = scalar_lea.hbm %s238_s2, 512 }
  0x35   :  { %p165_p2 = scmp.ne.s32.totalorder %s238_s2, %s164_s12  ;;  %p168_p3 = scmp.lt.u32.totalorder %s164_s12, %s238_s2 }
  0x37   :  { %p170_p4 = pnand %p168_p3, %p165_p2 }
  0x39   :  { %173 = shalt.err (!%p170_p4)
}
  0x3a   :  { %105 = dma.vmem_to_hbm [thread:$0]  %s103_s8, 512, %s238_s2, [#allocation4]  }
  0x3b   :  { %178 = dma.done.wait [#allocation4], 512  }
  0x3c   :  { %179 = vsyncadd [#allocation4], 4294966784 }
  0x3d   :  { %109 = vsyncpa [#allocation3], 1 }
  0x3e   :  { %110 = vsyncpa [#allocation4], 1 }
  0x3f   :  { %111 = vsyncpa [#allocation5], 1 }

</bundles_post_ra>
